<compile_context>
chip_gen: v7x
topology: tpu7x:2x2x1
jax: 0.10.0
libtpu: 0.0.40
codegen_flags: <defaults>
</compile_context>

<pallas_src>
import functools

import jax
import jax.numpy as jnp
from jax import lax
from jax.experimental import pallas as pl
from jax.experimental.pallas import tpu as pltpu

_LANE = 128
_DEFAULT_BLOCK_BYTES = 2 * 1024 * 1024   # per-input block cap (v5e/v6e)
_V7X_BLOCK_BYTES = 4 * 1024 * 1024       # amortize per-step overhead at ~3.2 TB/s


def _round_up(x, m):
    return (x + m - 1) // m * m


def _cdiv(a, b):
    return -(-a // b)


def _sublane(itemsize):
    # dtype minimum sublane granularity: (8,128) f32, (16,128) bf16, (32,128) 8-bit
    return {4: 8, 2: 16, 1: 32}.get(itemsize, 8)


def _target_block_bytes():
    """Generation-aware per-input block size (bigger blocks on v7x)."""
    try:
        info = pltpu.get_tpu_info()
        vmem = getattr(info, "vmem_capacity_bytes", None)
        if vmem is not None and vmem <= 96 * 1024 * 1024:   # v7x: 64 MiB / TC
            return _V7X_BLOCK_BYTES
    except Exception:
        pass
    return _DEFAULT_BLOCK_BYTES


def _row_ssd_kernel(rec_ref, ali_ref, out_ref, *, n_cols, tile_w, mask_cols):
    """Accumulate per-row sum((rec - ali)^2) over the lane axis into out_ref."""
    j = pl.program_id(1)

    # Output block index is constant over j -> block stays VMEM-resident across
    # the reduction axis; init on the first j step (classic accumulator pattern).
    @pl.when(j == 0)
    def _():
        out_ref[...] = jnp.zeros_like(out_ref)

    d = rec_ref[...].astype(jnp.float32) - ali_ref[...].astype(jnp.float32)
    sq = d * d
    if mask_cols:
        # The last lane block may read past the true column count; zero those
        # lanes with a select (not a multiply) so OOB garbage (inc. inf/nan)
        # cannot leak into the sum.  `tile_w` is a 128-multiple on this path.
        lane_ix = lax.broadcasted_iota(jnp.int32, sq.shape, 1)
        sq = jnp.where(lane_ix < (n_cols - j * tile_w), sq, 0.0)

    # Lane-chunk adds lower to VPU vreg adds; the final 128->1 fold is XLU
    # (free slot in this HBM-bound kernel).
    out_ref[...] += sq.sum(axis=-1, keepdims=True)


def _choose_tiles(R, L, itemsize, sub, block_bytes):
    """Balanced (tile_r, tile_w) with bounded rounding waste and >=2 row blocks."""
    # ---- lane (last) axis: prefer the full dim (legal for any L, no OOB lanes,
    # no mask); split only when one sublane-stripe of rows would blow the budget.
    if L * sub * itemsize <= block_bytes:
        tile_w = L
    else:
        max_w = max(_LANE, (block_bytes // (sub * itemsize)) // _LANE * _LANE)
        nj = _cdiv(L, max_w)
        tile_w = _round_up(_cdiv(L, nj), _LANE)   # balanced: waste <= one lane tile
    nj = _cdiv(L, tile_w)

    # ---- row (second-to-last) axis: balanced, sublane-aligned, >= 2 blocks so
    # v7x's two TensorCores both get work.  +256 B/row covers the lane-padded
    # (tile_r, 1) output block's share of VMEM.
    rows_cap = max(sub, (block_bytes // (tile_w * itemsize + 256)) // sub * sub)
    ni = max(2, _cdiv(R, rows_cap))
    ni += ni & 1                                   # prefer an even split (megacore)
    tile_r = _round_up(_cdiv(R, ni), sub)
    if tile_r >= R:
        tile_r = R        # single full-dim row block (legal even if R % sub != 0)
        ni = 1
    else:
        ni = _cdiv(R, tile_r)
    return tile_r, tile_w, ni, nj


def _per_row_ssd(rec2d, ali2d, block_bytes=None):
    """Per-row sum of squared differences over an (R, L) slab -> (R,) float32."""
    R, L = rec2d.shape
    it_r = jnp.dtype(rec2d.dtype).itemsize
    it_a = jnp.dtype(ali2d.dtype).itemsize
    itemsize = max(it_r, it_a)
    sub = max(_sublane(it_r), _sublane(it_a))
    if block_bytes is None:
        block_bytes = _target_block_bytes()

    tile_r, tile_w, ni, nj = _choose_tiles(R, L, itemsize, sub, block_bytes)
    mask_cols = (L % tile_w) != 0

    kernel = functools.partial(
        _row_ssd_kernel, n_cols=L, tile_w=tile_w, mask_cols=mask_cols)

    out = pl.pallas_call(
        kernel,
        out_shape=jax.ShapeDtypeStruct((ni * tile_r, 1), jnp.float32),
        grid_spec=pltpu.PrefetchScalarGridSpec(
            num_scalar_prefetch=0,
            grid=(ni, nj),
            in_specs=[
                pl.BlockSpec((tile_r, tile_w), lambda i, j: (i, j)),
                pl.BlockSpec((tile_r, tile_w), lambda i, j: (i, j)),
            ],
            out_specs=pl.BlockSpec((tile_r, 1), lambda i, j: (i, 0)),
        ),
        compiler_params=pltpu.CompilerParams(
            # i: independent row blocks (race-free) -> megacore sharding on v7x;
            # j: reduction axis (output block resident across it).
            dimension_semantics=("parallel", "arbitrary"),
            vmem_limit_bytes=32 * 1024 * 1024,
        ),
    )(rec2d, ali2d)
    # Rows >= R (from the last partial row block) hold garbage; drop them.
    return out[:R, 0]


@functools.partial(jax.jit,
                   static_argnames=("outplanes", "return_type", "block_bytes"))
def feature_mse_loss(feature_rec, feature_align, outplanes, return_type="sum",
                     block_bytes=None):
    """feature_rec / feature_align: NCHW; outplanes: tuple of group channel sizes."""
    N, C, H, W = feature_rec.shape
    assert sum(outplanes) == C

    # Contiguous reshape NCHW -> (N*C, H*W): no HBM data movement.
    rec2d = feature_rec.reshape(N * C, H * W)
    ali2d = feature_align.reshape(N * C, H * W)

    row_ssd = _per_row_ssd(rec2d, ali2d, block_bytes)        # (N*C,) f32

    # Per-row weight 1/(N*C_g*H*W); applying it outside the kernel keeps the
    # streaming kernel weight-free (no lane-padded weight DMA, fewer VALU ops).
    w_chan = jnp.concatenate(
        [jnp.full((cg,), 1.0 / (N * cg * H * W), jnp.float32) for cg in outplanes])
    w_row = jnp.tile(w_chan, (N,))                            # (N*C,)

    total = jnp.dot(row_ssd, w_row)
    if return_type == "sum":
        return total
    return total / len(outplanes)


def _reference(feature_rec, feature_align, outplanes, return_type="sum"):
    fr = feature_rec.astype(jnp.float32)
    fa = feature_align.astype(jnp.float32)
    offs = [0]
    for c in outplanes:
        offs.append(offs[-1] + c)
    losses = [jnp.mean((fr[:, s:e] - fa[:, s:e]) ** 2)
              for s, e in zip(offs[:-1], offs[1:])]
    tot = sum(losses)
    return tot if return_type == "sum" else tot / len(losses)


if __name__ == "__main__":
    key = jax.random.PRNGKey(0)
    k1, k2, k3, k4, k5, k6 = jax.random.split(key, 6)

    def check(rec, ali, outplanes, return_type, block_bytes=None, tol=1e-5):
        got = jax.block_until_ready(
            feature_mse_loss(rec, ali, outplanes, return_type, block_bytes))
        ref = _reference(rec, ali, outplanes, return_type)
        assert jnp.allclose(got, ref, rtol=tol, atol=tol), (got, ref)

    # 1) aligned f32, both return types
    N, H, W = 2, 16, 16
    outplanes1 = (4, 8, 4)
    rec1 = jax.random.normal(k1, (N, sum(outplanes1), H, W), jnp.float32)
    ali1 = jax.random.normal(k2, (N, sum(outplanes1), H, W), jnp.float32)
    check(rec1, ali1, outplanes1, "sum")
    check(rec1, ali1, outplanes1, "mean")

    # 2) unaligned f32 (14x14 maps, odd split): full-dim lane block, no padding
    outplanes2 = (3, 5)
    rec2 = jax.random.normal(k3, (2, sum(outplanes2), 14, 14), jnp.float32)
    ali2 = jax.random.normal(k4, (2, sum(outplanes2), 14, 14), jnp.float32)
    check(rec2, ali2, outplanes2, "sum")

    # 3) bf16 inputs: exercises the 16-row sublane granularity path
    check(rec2.astype(jnp.bfloat16), ali2.astype(jnp.bfloat16), outplanes2, "sum")

    # 4) tiny block budget forces multi-block lane axis + in-kernel column mask
    #    + ragged row blocks (26 rows, 576 cols -> grid (4, 2), tile (8, 384))
    outplanes4 = (6, 7)
    rec4 = jax.random.normal(k5, (2, sum(outplanes4), 24, 24), jnp.float32)
    ali4 = jax.random.normal(k6, (2, sum(outplanes4), 24, 24), jnp.float32)
    check(rec4, ali4, outplanes4, "mean", block_bytes=16 * 1024)

    print("KERNEL_OK")
</pallas_src>

<mosaic_0001>
module attributes {stable_mosaic.version = 11 : i64} {
  func.func @_row_ssd_kernel(%arg0: i32, %arg1: i32, %arg2: memref<16x256xf32, #tpu.memory_space<vmem>>, %arg3: memref<16x256xf32, #tpu.memory_space<vmem>>, %arg4: memref<16x1xf32, #tpu.memory_space<vmem>>) attributes {dimension_semantics = [#tpu.dimension_semantics<parallel>, #tpu.dimension_semantics<arbitrary>], iteration_bounds = array<i64: 2, 1>, scalar_prefetch = 0 : i64, scratch_operands = 0 : i64, tpu.core_type = #tpu.core_type<tc>, window_params = [{transform_indices = @transform_0, window_bounds = array<i64: 16, 256>}, {transform_indices = @transform_1, window_bounds = array<i64: 16, 256>}, {transform_indices = @transform_2, window_bounds = array<i64: 16, 1>}]} {
    %c0_i32 = arith.constant 0 : i32
    %0 = arith.cmpi eq, %arg1, %c0_i32 : i32
    %1 = arith.extui %0 : i1 to i32
    %c0_i32_0 = arith.constant 0 : i32
    %2 = arith.cmpi ne, %1, %c0_i32_0 : i32
    scf.if %2 {
      %cst_8 = arith.constant 0.000000e+00 : f32
      %12 = vector.broadcast %cst_8 : f32 to vector<16x1xf32>
      %c0_9 = arith.constant 0 : index
      %c0_10 = arith.constant 0 : index
      %13 = vector.load %arg4[%c0_9, %c0_10] : memref<16x1xf32, #tpu.memory_space<vmem>>, vector<16x1xf32>
      tpu.vector_store %arg4[%c0_9, %c0_10], %12 {strides = array<i32>} : memref<16x1xf32, #tpu.memory_space<vmem>>, vector<16x1xf32>,
    } else {
    }
    %c0 = arith.constant 0 : index
    %c0_1 = arith.constant 0 : index
    %3 = vector.load %arg2[%c0, %c0_1] : memref<16x256xf32, #tpu.memory_space<vmem>>, vector<16x256xf32>
    %c0_2 = arith.constant 0 : index
    %c0_3 = arith.constant 0 : index
    %4 = vector.load %arg3[%c0_2, %c0_3] : memref<16x256xf32, #tpu.memory_space<vmem>>, vector<16x256xf32>
    %5 = arith.subf %3, %4 : vector<16x256xf32>
    %6 = arith.mulf %5, %5 : vector<16x256xf32>
    %c0_4 = arith.constant 0 : index
    %c0_5 = arith.constant 0 : index
    %7 = vector.load %arg4[%c0_4, %c0_5] : memref<16x1xf32, #tpu.memory_space<vmem>>, vector<16x1xf32>
    %cst = arith.constant dense<0.000000e+00> : vector<16xf32>
    %8 = vector.multi_reduction <add>, %6, %cst [1] : vector<16x256xf32> to vector<16xf32>
    %9 = vector.shape_cast %8 : vector<16xf32> to vector<16x1xf32>
    %10 = arith.addf %7, %9 : vector<16x1xf32>
    %c0_6 = arith.constant 0 : index
    %c0_7 = arith.constant 0 : index
    %11 = vector.load %arg4[%c0_6, %c0_7] : memref<16x1xf32, #tpu.memory_space<vmem>>, vector<16x1xf32>
    tpu.vector_store %arg4[%c0_6, %c0_7], %10 {strides = array<i32>} : memref<16x1xf32, #tpu.memory_space<vmem>>, vector<16x1xf32>,
    return
  }
  func.func @transform_0(%arg0: i32, %arg1: i32) -> (i32, i32) {
    %c0_i32 = arith.constant 0 : i32
    return %arg0, %arg1 : i32, i32
  }
  func.func @transform_1(%arg0: i32, %arg1: i32) -> (i32, i32) {
    %c0_i32 = arith.constant 0 : i32
    return %arg0, %arg1 : i32, i32
  }
  func.func @transform_2(%arg0: i32, %arg1: i32) -> (i32, i32) {
    %c0_i32 = arith.constant 0 : i32
    %c0_i32_0 = arith.constant 0 : i32
    return %arg0, %c0_i32 : i32, i32
  }
}

</mosaic_0001>

<bundles_post_ra>
// kernel: tile.6
= control target key start
LH: loop header
LB: loop body
LE: loop exit
PB: predicated region body
PF: predicated region fallthrough
CT: control target
= control target key end

     0   :  { %s22_s0 = inlined_call_operand.vmem [shape: f32[16], index: 0, kind: input, shape index: {}]   ;;  %s23_s1 = inlined_call_operand.vmem [shape: f32[2,16], index: 1, kind: output, shape index: {}]  }
   0x1   :  { %v4_v0 = vld [vmem:[%s22_s0] ss:$0 sm:$0xff] }
   0x2   :  { %5 = vst [vmem:[%s23_s1] sm:$0x3] %v4_v0 }

// kernel: tile.7
= control target key start
LH: loop header
LB: loop body
LE: loop exit
PB: predicated region body
PF: predicated region fallthrough
CT: control target
= control target key end

     0   :  { %vm7_vm0 = vcmask 130048   ;;  %vm13_vm1 = vcmask 261248   ;;  %s39_s0 = inlined_call_operand.vmem [shape: f32[2,16], index: 0, kind: input, shape index: {}]   ;;  %s40_s1 = inlined_call_operand.vmem [shape: f32[32], index: 1, kind: output, shape index: {}]  }
   0x1   :  { %v4_v0 = vld [vmem:[%s39_s0] sm:$0x3]  ;;  %s22_s0 = smov 16  }
   0x2   :  { %5 = vst [vmem:[#allocation1] sm:$0x3] %v4_v0 }
   0x9   :  { %v10_v1 = vld [vmem:[#allocation1 + $0x1] sm:$0x1]   ;;  %v6_v2 = vld [vmem:[#allocation1] sm:$0x1]  }
   0xa   :  { %11 = vrot.lane.b32.xlu0 %v10_v1, %s22_s0  ;;  %8 = vst.msk [vmem:[#allocation0] sm:$0x1] %vm7_vm0, %v6_v2  }
  0x7c   :  { %v12_v3 = vpop.permute.xlu0 %11  }
  0x7d   :  { %14 = vst.msk [vmem:[#allocation0] sm:$0x1] %vm13_vm1, %v12_v3  }
  0x84   :  { %v18_v4 = vld [vmem:[#allocation0] sm:$0x1] }
  0x85   :  { %20 = vst [vmem:[%s40_s1] sm:$0x1] %v18_v4 }

// kernel: feature_mse_loss.1
= control target key start
LH: loop header
LB: loop body
LE: loop exit
PB: predicated region body
PF: predicated region fallthrough
CT: control target
= control target key end

     0   :  { %s426_s9 = smov 0   ;;  %s428_s10 = smov 0   ;;  %s466_s0 = inlined_call_operand.vmem [shape: f32[32,256], index: 0, kind: input, shape index: {}]   ;;  %s467_s1 = inlined_call_operand.vmem [shape: f32[32,256], index: 1, kind: input, shape index: {}]   ;;  %s468_s2 = inlined_call_operand.vmem [shape: f32[32,1], index: 2, kind: output, shape index: {}]  }
   0x1   :  { %s430_s11 = smov 0  }
   0x2 LB: > { %s24_s12 = sadd.s32 1, %s404_s10  ;;  %p348_p0 = scmp.ge.s32.totalorder %s408_s11, 1  ;;  %s408_s11 = sphi %s430_s11, %s12_s11   ;;  %s404_s10 = sphi %s428_s10, %s470_s10   ;;  %s400_s9 = sphi %s426_s9, %s469_s9  }
   0x3   : > { %p26_p1 = scmp.ge.s32.totalorder %s24_s12, 2  ;;  %p152_p2 = scmp.lt.s32.totalorder %s408_s11, 3 }
   0x5   : > { %s472_s12 = smov (%p26_p1, %s24_s12), 0  ;;  %p153_p3 = pnand %p348_p0, %p152_p2 }
   0x6   : > { %s349_s13 = sshll.u32 (!%p153_p3), %s400_s9, 1  ;;  %vm223_vm0 = vcmask (!%p153_p3), 7168   ;;  %v410_v7 = vmov (!%p153_p3), 0.0  }
   0x7   : > { %156 = sbr.rel (%p153_p3) target bundleno = 174 (0xae), region = 28  ;;  %p191_p4 = scmp.lt.s32.totalorder (!%p153_p3), %s349_s13, 3 }
   0xe   : > { %s474_s13 = smov (!%p191_p4, %s349_s13), 3 }
   0xf   : > { %s359_s14 = sshll.u32 %s474_s13, 4  ;;  %s356_s15 = sshll.u32 %s474_s13, 3 }
  0x10   : > { %s198_s18 = scalar_lea.vmem %s466_s0, %s359_s14  ;;  %s210_s21 = scalar_lea.vmem %s467_s1, %s359_s14 }
  0x11   : > { %v226_v0 = vld [vmem:[%s198_s18] sm:$0xff]  ;;  %v227_v1 = vld [vmem:[%s198_s18 + $0x8] sm:$0xff]  ;;  %s217_s24 = scalar_lea.vmem %s468_s2, %s356_s15  ;;  %v228_v5 = vld [vmem:[%s198_s18 + $0x10] sm:$0xff] }
  0x12   : > { %v230_v2 = vld [vmem:[%s210_s21] sm:$0xff]  ;;  %v231_v3 = vld [vmem:[%s210_s21 + $0x8] sm:$0xff]  ;;  %v229_v6 = vld [vmem:[%s198_s18 + $0x18] sm:$0xff]  ;;  %224 = vst.msk [vmem:[%s217_s24] sm:$0xff] %vm223_vm0, %v410_v7 }
  0x13   : > { %v234_v4 = vsub.f32 %v226_v0, %v230_v2  ;;  %v235_v8 = vsub.f32 %v227_v1, %v231_v3  ;;  %v232_v9 = vld [vmem:[%s210_s21 + $0x10] sm:$0xff]  ;;  %v233_v10 = vld [vmem:[%s210_s21 + $0x18] sm:$0xff]  ;;  %225 = vst.msk [vmem:[%s217_s24 + $0x8] sm:$0xff] %vm223_vm0, %v410_v7 }
  0x14   : > { %v236_v12 = vsub.f32 %v228_v5, %v232_v9  ;;  %v237_v13 = vsub.f32 %v229_v6, %v233_v10 }
  0x15   : > { %v238_v11 = vmul.f32 %v234_v4, %v234_v4  ;;  %v239_v14 = vmul.f32 %v235_v8, %v235_v8 }
  0x16   : > { %v240_v15 = vmul.f32 %v236_v12, %v236_v12  ;;  %v241_v16 = vmul.f32 %v237_v13, %v237_v13 }
  0x17   : > { %v244_v17 = vadd.f32 %v239_v14, %v238_v11 }
  0x18   : > { %v247_v18 = vadd.f32 %v241_v16, %v240_v15 }
  0x19   : > { %245 = vadd.xlane.f32.xlu0 %v244_v17  ;;  %v242_v19 = vld [vmem:[%s217_s24] sm:$0xff] }
  0x1a   : > { %v243_v21 = vld [vmem:[%s217_s24 + $0x8] sm:$0xff] }
  0x1d   : > { %248 = vadd.xlane.f32.xlu0 %v247_v18 }
  0xa6   : > { %v246_v20 = vpop.xlane.xlu0 %245 }
  0xa7   : > { %v250_v22 = vadd.f32 %v246_v20, %v242_v19 }
  0xa9   : > { %253 = vst.msk [vmem:[%s217_s24] sm:$0xff] %vm223_vm0, %v250_v22 }
  0xaa   : > { %v249_v23 = vpop.xlane.xlu0 %248 }
  0xab   : > { %v251_v24 = vadd.f32 %v249_v23, %v243_v21 }
  0xad   : > { %254 = vst.msk [vmem:[%s217_s24 + $0x8] sm:$0xff] %vm223_vm0, %v251_v24 }
  0xae PF: > { %s12_s11 = sadd.s32 1, %s408_s11   ;;  %s469_s9 = smov %s404_s10 }
  0xaf   : > { %p9_p5 = scmp.ge.s32.totalorder %s12_s11, 4   ;;  %s470_s10 = smov %s472_s12 }
  0xb1   :  { %11 = sbr.rel (!%p9_p5) target bundleno = 2 (0x2), region = 65 }

</bundles_post_ra>
